<compile_context>
chip_gen: v6e
topology: v6e:2x2x1
jax: 0.10.0
libtpu: 0.0.40
codegen_flags: <defaults>
</compile_context>

<pallas_src>
import abc
import math

import jax
import jax.numpy as jnp
from jax.experimental import pallas as pl
from jax.experimental.pallas import tpu as pltpu

_LOG_2PI = math.log(2.0 * math.pi)

_LANE = 128
_MAX_ROW_TILE = 1024          # 1024 * 128 * 4 B = 512 KiB per f32 MC-slice
_MAX_BLOCK_BYTES = 6 << 20    # per-buffer budget for the latent / output block
_VMEM_LIMIT_CAP = 48 << 20    # stay well below v7x's 64 MiB physical VMEM


def _gaussian_log_cond_prob_kernel(scal_ref, y_ref, f_ref, out_ref):
    """One grid step handles a (mc_tile, row_tile, 128) slab.

    scal_ref : SMEM (2,) f32                 [-0.5*(log 2pi + log_var), -0.5/var]
    y_ref    : VMEM (row_tile, 128)          true outputs (resident across MC axis)
    f_ref    : VMEM (mc_tile, row_tile, 128) latent function values (input dtype)
    out_ref  : VMEM (mc_tile, row_tile, 128) log p(y | f)
    """
    const = scal_ref[0]
    neg_half_inv_var = scal_ref[1]
    y = y_ref[...].astype(jnp.float32)
    f = f_ref[...].astype(jnp.float32)
    diff = f - y                                   # broadcasts (row,128) over MC tile
    out_ref[...] = (const + neg_half_inv_var * (diff * diff)).astype(out_ref.dtype)


def gaussian_log_cond_prob(output, latent_val, log_noise_var):
    """output: (batch, Dout); latent_val: (MC, batch, Q=Dout); log_noise_var: (1,).

    Returns (MC, batch, Q) in the promoted input dtype (math done in f32 in-register).
    """
    output = jnp.asarray(output)
    latent_val = jnp.asarray(latent_val)
    mc, batch, q = latent_val.shape
    assert output.shape == (batch, q), (output.shape, latent_val.shape)
    out_dtype = jnp.promote_types(output.dtype, latent_val.dtype)

    # ---- lane-dense flattening: (batch, q) -> (rows, 128) --------------------
    n = batch * q
    if n % _LANE == 0:
        # zero-copy path: plain reshapes, no pad / trailing slice HBM passes
        rows = n // _LANE
        y_flat = output.reshape(rows, _LANE)
        f_flat = latent_val.reshape(mc, rows, _LANE)
        padded = False
    else:
        # TODO(synk): ragged batch*Dout; pad+slice fallback. Could instead mask the
        # tail block in-kernel (pltpu.store with a lane mask) to avoid extra traffic.
        rows = pl.cdiv(n, _LANE)
        n_pad = rows * _LANE
        y_flat = jnp.pad(output.reshape(-1), (0, n_pad - n)).reshape(rows, _LANE)
        f_flat = jnp.pad(latent_val.reshape(mc, -1),
                         ((0, 0), (0, n_pad - n))).reshape(mc, rows, _LANE)
        padded = True

    # ---- row tiling: full-dim block when it fits, else 1024-row tiles ---------
    row_tile = rows if rows <= _MAX_ROW_TILE else _MAX_ROW_TILE
    grid_rows = pl.cdiv(rows, row_tile)

    # ---- MC tiling: cdiv-based (no divisor search collapse) -------------------
    f_item = latent_val.dtype.itemsize
    o_item = out_dtype.itemsize
    y_item = output.dtype.itemsize
    bytes_per_mc_slice = row_tile * _LANE * max(f_item, o_item)
    mc_cap = max(1, _MAX_BLOCK_BYTES // bytes_per_mc_slice)
    mc_tile = min(mc, mc_cap)
    grid_mc = pl.cdiv(mc, mc_tile)

    # ---- hoist scalar math out of the kernel ----------------------------------
    log_var = jnp.asarray(log_noise_var, jnp.float32).reshape(-1)[0]
    scal = jnp.stack([-0.5 * (_LOG_2PI + log_var),
                      -0.5 * jnp.exp(-log_var)]).astype(jnp.float32)

    # ---- explicit VMEM budget: f + out + y, double-buffered, plus slack -------
    f_blk = mc_tile * row_tile * _LANE * f_item
    o_blk = mc_tile * row_tile * _LANE * o_item
    y_blk = row_tile * _LANE * y_item
    vmem_limit = int(min(_VMEM_LIMIT_CAP,
                         max(2 * (f_blk + o_blk + y_blk) + (2 << 20), 4 << 20)))

    cost = pl.CostEstimate(
        flops=4 * mc * rows * _LANE,
        transcendentals=0,
        bytes_accessed=mc * rows * _LANE * (f_item + o_item) + rows * _LANE * y_item,
    )

    out_flat = pl.pallas_call(
        _gaussian_log_cond_prob_kernel,
        out_shape=jax.ShapeDtypeStruct((mc, rows, _LANE), out_dtype),
        grid_spec=pltpu.PrefetchScalarGridSpec(
            num_scalar_prefetch=0,
            grid=(grid_rows, grid_mc),          # MC innermost -> y stays resident
            in_specs=[
                pl.BlockSpec(memory_space=pltpu.MemorySpace.SMEM),       # scalars
                pl.BlockSpec((row_tile, _LANE), lambda i, m: (i, 0)),    # y
                pl.BlockSpec((mc_tile, row_tile, _LANE),
                             lambda i, m: (m, i, 0)),                    # latent f
            ],
            out_specs=pl.BlockSpec((mc_tile, row_tile, _LANE),
                                   lambda i, m: (m, i, 0)),
        ),
        compiler_params=pltpu.CompilerParams(
            dimension_semantics=("parallel", "parallel"),
            vmem_limit_bytes=vmem_limit),
        cost_estimate=cost,
    )(scal, y_flat, f_flat)

    if padded:
        out_flat = out_flat.reshape(mc, rows * _LANE)[:, :n]
    return out_flat.reshape(mc, batch, q)


class BaseLikelihood(metaclass=abc.ABCMeta):
    """JAX mirror of vardl's abstract BaseLikelihood interface."""

    @abc.abstractmethod
    def log_cond_prob(self, output, latent_val):
        raise NotImplementedError('Subclass should implement this.')

    @abc.abstractmethod
    def predict(self, *args, **kwargs):
        raise NotImplementedError('Subclass should implement this.')

    def forward(self, *inputs):
        # TODO(synk): reference implementation recurses into itself forever;
        # nothing meaningful to lower.
        raise NotImplementedError('BaseLikelihood.forward has no defined semantics.')


class GaussianLikelihood(BaseLikelihood):
    """Concrete likelihood: log N(y | f, exp(log_noise_var))."""

    def __init__(self, log_noise_var=-1.0):
        self.log_noise_var = jnp.asarray([log_noise_var], dtype=jnp.float32)

    def log_cond_prob(self, output, latent_val):
        return gaussian_log_cond_prob(output, latent_val, self.log_noise_var)

    def predict(self, latent_val):
        # Predictive mean over MC samples (plain-JAX glue, no hot path).
        return jnp.mean(latent_val, axis=0)


def _reference_log_cond_prob(output, latent_val, log_noise_var):
    var = jnp.exp(log_noise_var[0])
    return (-0.5 * _LOG_2PI - 0.5 * log_noise_var[0]
            - 0.5 * (output[None, :, :] - latent_val) ** 2 / var)


if __name__ == "__main__":
    key = jax.random.PRNGKey(0)
    k1, k2 = jax.random.split(key)

    MC, BATCH, DOUT = 8, 16, 32
    output = jax.random.normal(k1, (BATCH, DOUT), dtype=jnp.float32)
    latent_val = jax.random.normal(k2, (MC, BATCH, DOUT), dtype=jnp.float32)

    lik = GaussianLikelihood(log_noise_var=-1.0)

    result = lik.log_cond_prob(output, latent_val)
    result = jax.block_until_ready(result)

    ref = _reference_log_cond_prob(output, latent_val, lik.log_noise_var)
    assert result.shape == (MC, BATCH, DOUT)
    assert jnp.allclose(result, ref, atol=1e-5, rtol=1e-5)

    print("KERNEL_OK")
</pallas_src>

<mosaic_0001>
module attributes {stable_mosaic.version = 11 : i64} {
  func.func @_gaussian_log_cond_prob_kernel(%arg0: i32, %arg1: i32, %arg2: memref<2xf32, #tpu.memory_space<smem>>, %arg3: memref<4x128xf32, #tpu.memory_space<vmem>>, %arg4: memref<8x4x128xf32, #tpu.memory_space<vmem>>, %arg5: memref<8x4x128xf32, #tpu.memory_space<vmem>>) attributes {dimension_semantics = [#tpu.dimension_semantics<parallel>, #tpu.dimension_semantics<parallel>], iteration_bounds = array<i64: 1, 1>, scalar_prefetch = 0 : i64, scratch_operands = 0 : i64, tpu.core_type = #tpu.core_type<tc>, window_params = [{transform_indices = @transform_0, window_bounds = array<i64: 2>}, {transform_indices = @transform_1, window_bounds = array<i64: 4, 128>}, {transform_indices = @transform_2, window_bounds = array<i64: 8, 4, 128>}, {transform_indices = @transform_3, window_bounds = array<i64: 8, 4, 128>}]} {
    %c0 = arith.constant 0 : index
    %0 = memref.load %arg2[%c0] : memref<2xf32, #tpu.memory_space<smem>>
    %c1 = arith.constant 1 : index
    %1 = memref.load %arg2[%c1] : memref<2xf32, #tpu.memory_space<smem>>
    %c0_0 = arith.constant 0 : index
    %c0_1 = arith.constant 0 : index
    %2 = vector.load %arg3[%c0_0, %c0_1] : memref<4x128xf32, #tpu.memory_space<vmem>>, vector<4x128xf32>
    %c0_2 = arith.constant 0 : index
    %c0_3 = arith.constant 0 : index
    %c0_4 = arith.constant 0 : index
    %3 = vector.load %arg4[%c0_2, %c0_3, %c0_4] : memref<8x4x128xf32, #tpu.memory_space<vmem>>, vector<8x4x128xf32>
    %4 = vector.shape_cast %2 : vector<4x128xf32> to vector<1x4x128xf32>
    %5 = vector.broadcast %4 : vector<1x4x128xf32> to vector<8x4x128xf32>
    %6 = arith.subf %3, %5 : vector<8x4x128xf32>
    %7 = arith.mulf %6, %6 : vector<8x4x128xf32>
    %8 = vector.broadcast %1 : f32 to vector<8x4x128xf32>
    %9 = arith.mulf %8, %7 : vector<8x4x128xf32>
    %10 = vector.broadcast %0 : f32 to vector<8x4x128xf32>
    %11 = arith.addf %10, %9 : vector<8x4x128xf32>
    %c0_5 = arith.constant 0 : index
    %c0_6 = arith.constant 0 : index
    %c0_7 = arith.constant 0 : index
    %12 = vector.load %arg5[%c0_5, %c0_6, %c0_7] : memref<8x4x128xf32, #tpu.memory_space<vmem>>, vector<8x4x128xf32>
    tpu.vector_store %arg5[%c0_5, %c0_6, %c0_7], %11 {strides = array<i32>} : memref<8x4x128xf32, #tpu.memory_space<vmem>>, vector<8x4x128xf32>,
    return
  }
  func.func @transform_0(%arg0: i32, %arg1: i32) -> i32 {
    %c0_i32 = arith.constant 0 : i32
    %c0_i32_0 = arith.constant 0 : i32
    return %c0_i32 : i32
  }
  func.func @transform_1(%arg0: i32, %arg1: i32) -> (i32, i32) {
    %c0_i32 = arith.constant 0 : i32
    %c0_i32_0 = arith.constant 0 : i32
    return %arg0, %c0_i32 : i32, i32
  }
  func.func @transform_2(%arg0: i32, %arg1: i32) -> (i32, i32, i32) {
    %c0_i32 = arith.constant 0 : i32
    %c0_i32_0 = arith.constant 0 : i32
    return %arg1, %arg0, %c0_i32 : i32, i32, i32
  }
  func.func @transform_3(%arg0: i32, %arg1: i32) -> (i32, i32, i32) {
    %c0_i32 = arith.constant 0 : i32
    %c0_i32_0 = arith.constant 0 : i32
    return %arg1, %arg0, %c0_i32 : i32, i32, i32
  }
}

</mosaic_0001>

<bundles_post_ra>
// kernel: tpu_custom_call.1
= control target key start
LH: loop header
LB: loop body
LE: loop exit
PB: predicated region body
PF: predicated region fallthrough
CT: control target
= control target key end

     0   :  { %8 = vsyncpa [#allocation5], 0  ;;  %s251_s0 = inlined_call_operand.hbm [shape: f32[2], index: 0, kind: input, shape index: {}]   ;;  %s252_s1 = inlined_call_operand.hbm [shape: f32[4,128], index: 1, kind: input, shape index: {}]   ;;  %s253_s2 = inlined_call_operand.hbm [shape: f32[8,4,128], index: 2, kind: input, shape index: {}]   ;;  %s254_s3 = inlined_call_operand.hbm [shape: f32[8,4,128], index: 3, kind: output, shape index: {}]  }
   0x1   :  { %9 = vsyncpa [#allocation3], 0 }
   0x2   :  { %10 = vsyncpa [#allocation8], 0 }
   0x3   :  { %11 = vsyncpa [#allocation4], 0  ;;  %s207_s12 = smov [#allocation2]   ;;  %s208_s15 = smov [#allocation6]  }
   0x4   :  { %19 = dma.hbm_to_smem %s251_s0, 16, %s207_s12, [#allocation5]  }
   0x5   :  { %s26_s16 = sshll.u32 %s208_s15, 4  ;;  %s209_s17 = smov [#allocation7]   ;;  %s27_s16 = int_to_ptr.vmem [resolvable:$true] %s26_s16 }
   0x6   :  { %s35_s18 = sshll.u32 %s209_s17, 4  ;;  %s147_s19 = scalar_lea.vmem %s27_s16, 64  ;;  %s36_s18 = int_to_ptr.vmem [resolvable:$true] %s35_s18 }
   0x7   :  { %p148_p0 = scmp.ne.s32.totalorder %s27_s16, %s147_s19  ;;  %p152_p1 = scmp.lt.s32.totalorder %s27_s16, %s27_s16 }
   0x8   :  { %p153_p2 = scmp.lt.s32.totalorder %s147_s19, %s147_s19 }
   0xa   :  { %p154_p3 = por %p153_p2, %p152_p1 }
   0xc   :  { %p155_p4 = pnand %p154_p3, %p148_p0 }
   0xe   :  { %158 = shalt.err (!%p155_p4)
}
   0xf   :  { %29 = dma.hbm_to_vmem [thread:$0]  %s252_s1, 64, %s27_s16, [#allocation3]  }
  0x10   :  { %s167_s22 = scalar_lea.vmem %s36_s18, 512  ;;  %p172_p6 = scmp.lt.s32.totalorder %s36_s18, %s36_s18 }
  0x11   :  { %p168_p5 = scmp.ne.s32.totalorder %s36_s18, %s167_s22  ;;  %p173_p7 = scmp.lt.s32.totalorder %s167_s22, %s167_s22 }
  0x13   :  { %p174_p8 = por %p173_p7, %p172_p6 }
  0x15   :  { %p175_p9 = pnand %p174_p8, %p168_p5 }
  0x17   :  { %178 = shalt.err (!%p175_p9)
}
  0x18   :  { %s210_s0 = smov 64   ;;  %s211_s23 = smov 4  }
  0x19   :  { %41 = dma.hbm_to_vmem [thread:$0]  %s253_s2, 512, %s36_s18, [#allocation8], %s210_s0, %s210_s0, %s211_s23  }
  0x1a   :  { %199 = dma.done.wait [#allocation5], 16  }
  0x1b   :  { %200 = vsyncadd [#allocation5], 4294967280 }
  0x1c   :  { %201 = dma.done.wait [#allocation3], 64  }
  0x1d   :  { %202 = vsyncadd [#allocation3], 4294967232 }
  0x1e   :  { %203 = dma.done.wait [#allocation8], 512  }
  0x1f   :  { %204 = vsyncadd [#allocation8], 4294966784 }
  0x20   :  { %51 = sfence }
  0x21   :  { %s52_s1 = sld [smem:[#allocation2]]  ;;  %v54_v0 = vld [vmem:[#allocation6] sm:$0xf]  ;;  %v55_v1 = vld [vmem:[#allocation7] sm:$0xf]  ;;  %s212_s2 = smov [#allocation9]  }
  0x22   :  { %s124_s26 = sld [smem:[#allocation2 + $0x1]]  ;;  %v63_v2 = vsub.f32 %v55_v1, %v54_v0  ;;  %v56_v3 = vld [vmem:[#allocation7 + $0x4] sm:$0xf]  ;;  %v57_v4 = vld [vmem:[#allocation7 + $0x8] sm:$0xf]  ;;  %s110_s27 = sshll.u32 %s212_s2, 4  ;;  %s111_s27 = int_to_ptr.vmem [resolvable:$true] %s110_s27 }
  0x23   :  { %v64_v5 = vsub.f32 %v56_v3, %v54_v0  ;;  %v65_v6 = vsub.f32 %v57_v4, %v54_v0  ;;  %v58_v7 = vld [vmem:[#allocation7 + $0xc] sm:$0xf]  ;;  %v59_v8 = vld [vmem:[#allocation7 + $0x10] sm:$0xf]  ;;  %v60_v9 = vld [vmem:[#allocation7 + $0x14] sm:$0xf]  ;;  %p184_p11 = scmp.lt.s32.totalorder %s111_s27, %s111_s27 }
  0x24   :  { %v71_v10 = vmul.f32 %v63_v2, %v63_v2  ;;  %v66_v11 = vsub.f32 %v58_v7, %v54_v0  ;;  %v67_v12 = vsub.f32 %v59_v8, %v54_v0  ;;  %v68_v13 = vsub.f32 %v60_v9, %v54_v0  ;;  %v61_v14 = vld [vmem:[#allocation7 + $0x18] sm:$0xf]  ;;  %v62_v15 = vld [vmem:[#allocation7 + $0x1c] sm:$0xf]  ;;  %s179_s28 = scalar_lea.vmem %s111_s27, 512 }
  0x25   :  { %v72_v16 = vmul.f32 %v64_v5, %v64_v5  ;;  %v73_v17 = vmul.f32 %v65_v6, %v65_v6  ;;  %v69_v18 = vsub.f32 %v61_v14, %v54_v0  ;;  %v70_v19 = vsub.f32 %v62_v15, %v54_v0  ;;  %p180_p10 = scmp.ne.s32.totalorder %s111_s27, %s179_s28  ;;  %p185_p12 = scmp.lt.s32.totalorder %s179_s28, %s179_s28 }
  0x26   :  { %v74_v20 = vmul.f32 %v66_v11, %v66_v11  ;;  %v75_v21 = vmul.f32 %v67_v12, %v67_v12  ;;  %v76_v22 = vmul.f32 %v68_v13, %v68_v13 }
  0x27   :  { %v77_v23 = vmul.f32 %v69_v18, %v69_v18  ;;  %v78_v24 = vmul.f32 %v70_v19, %v70_v19  ;;  %v88_v26 = vstv %s52_s1  ;;  %p186_p13 = por %p185_p12, %p184_p11 }
  0x28   :  { %v79_v25 = vstv %s124_s26 }
  0x29   :  { %v80_v27 = vmul.f32 %v79_v25, %v71_v10  ;;  %v81_v28 = vmul.f32 %v79_v25, %v72_v16  ;;  %v82_v29 = vmul.f32 %v79_v25, %v73_v17  ;;  %v83_v30 = vmul.f32 %v79_v25, %v74_v20  ;;  %p187_p0 = pnand %p186_p13, %p180_p10 }
  0x2a   :  { %v84_v31 = vmul.f32 %v79_v25, %v75_v21  ;;  %v85_v32 = vmul.f32 %v79_v25, %v76_v22  ;;  %v86_v33 = vmul.f32 %v79_v25, %v77_v23  ;;  %v87_v34 = vmul.f32 %v79_v25, %v78_v24 }
  0x2b   :  { %v89_v35 = vadd.f32 %v88_v26, %v80_v27  ;;  %v90_v36 = vadd.f32 %v88_v26, %v81_v28  ;;  %v91_v37 = vadd.f32 %v88_v26, %v82_v29  ;;  %v92_v38 = vadd.f32 %v88_v26, %v83_v30 }
  0x2c   :  { %v93_v39 = vadd.f32 %v88_v26, %v84_v31  ;;  %v94_v40 = vadd.f32 %v88_v26, %v85_v32  ;;  %v95_v41 = vadd.f32 %v88_v26, %v86_v33  ;;  %v96_v42 = vadd.f32 %v88_v26, %v87_v34 }
  0x2d   :  { %97 = vst [vmem:[#allocation9] sm:$0xf] %v89_v35  ;;  %98 = vst [vmem:[#allocation9 + $0x4] sm:$0xf] %v90_v36 }
  0x2e   :  { %99 = vst [vmem:[#allocation9 + $0x8] sm:$0xf] %v91_v37  ;;  %100 = vst [vmem:[#allocation9 + $0xc] sm:$0xf] %v92_v38 }
  0x2f   :  { %101 = vst [vmem:[#allocation9 + $0x10] sm:$0xf] %v93_v39  ;;  %102 = vst [vmem:[#allocation9 + $0x14] sm:$0xf] %v94_v40 }
  0x30   :  { %103 = vst [vmem:[#allocation9 + $0x18] sm:$0xf] %v95_v41  ;;  %104 = vst [vmem:[#allocation9 + $0x1c] sm:$0xf] %v96_v42 }
  0x31   :  { %190 = shalt.err (!%p187_p0)
}
  0x32   :  { %116 = dma.vmem_to_hbm [thread:$0]  %s111_s27, 512, %s254_s3, [#allocation4], %s210_s0, %s210_s0, %s211_s23  }
  0x33   :  { %205 = dma.done.wait [#allocation4], 512  }
  0x34   :  { %206 = vsyncadd [#allocation4], 4294966784 }
  0x35   :  { %120 = vsyncpa [#allocation3], 1 }
  0x36   :  { %121 = vsyncpa [#allocation8], 1 }
  0x37   :  { %122 = vsyncpa [#allocation4], 1 }
  0x38   :  { %123 = vsyncpa [#allocation5], 1 }

</bundles_post_ra>
